<compile_context>
chip_gen: v7x
topology: tpu7x:2x2x1
jax: 0.10.0
libtpu: 0.0.40
codegen_flags: <defaults>
</compile_context>

<pallas_src>
import functools
import math

import jax
import jax.numpy as jnp
from jax import lax
from jax.experimental import pallas as pl
from jax.experimental.pallas import tpu as pltpu


_SQRT_HALF = 1.0 / math.sqrt(2.0)
_VMEM_LIMIT = 48 * 1024 * 1024  # below v7x physical (64 MiB), above default scoped limits


def _gelu_exact(x):
    # torch nn.GELU() default is the exact (erf-based) GELU.
    return 0.5 * x * (1.0 + lax.erf(x * _SQRT_HALF))


def _round_up(n, m):
    return (n + m - 1) // m * m


def _pick_tile(n, requested):
    # Token tile: multiple of 8 (f32 sublane), never larger than the rounded token count.
    return min(requested, _round_up(n, 8))


def _pad_rows(x, n_padded):
    n = x.shape[0]
    if n_padded == n:
        return x
    return jnp.pad(x, ((0, n_padded - n), (0, 0)))


# ----------------------------------------------------------------------------
# MLP: Linear(D->H) -> GELU -> Linear(H->D)  (dropout p=0.0 == identity)
# Grid: (token tiles [parallel], H tiles [arbitrary reduction]) with f32 accumulator.
# ----------------------------------------------------------------------------
def _mlp_kernel(x_ref, w1_ref, b1_ref, w2_ref, b2_ref, o_ref, acc_ref):
    h_idx = pl.program_id(1)

    @pl.when(h_idx == 0)
    def _():
        acc_ref[...] = jnp.zeros_like(acc_ref)

    # bf16 operands on the MXU, f32 accumulation; bias + GELU in f32.
    h = jnp.dot(x_ref[...], w1_ref[...], preferred_element_type=jnp.float32)
    h = _gelu_exact(h + b1_ref[...])
    acc_ref[...] += jnp.dot(h.astype(w2_ref.dtype), w2_ref[...],
                            preferred_element_type=jnp.float32)

    @pl.when(h_idx == pl.num_programs(1) - 1)
    def _():
        o_ref[...] = (acc_ref[...] + b2_ref[...]).astype(o_ref.dtype)


def mlp_forward(x, w1, b1, w2, b2, *, tm=256, th=512):
    """x: [N, D] f32; w1: [D, H]; b1: [H]; w2: [H, D]; b2: [D] -> [N, D] f32."""
    N, D = x.shape
    H = w1.shape[1]

    tm = _pick_tile(N, tm)
    n_pad = _round_up(N, tm)
    if H % th != 0:
        th = H  # fall back to a single hidden slice for small/odd H

    x_p = _pad_rows(x, n_pad).astype(jnp.bfloat16)
    w1_b = w1.astype(jnp.bfloat16)
    w2_b = w2.astype(jnp.bfloat16)
    b1_2d = b1.reshape(1, H).astype(jnp.float32)
    b2_2d = b2.reshape(1, D).astype(jnp.float32)

    cost = pl.CostEstimate(
        flops=4 * n_pad * D * H,
        transcendentals=n_pad * H,
        bytes_accessed=(x_p.size * 2 + w1_b.size * 2 + w2_b.size * 2
                        + b1_2d.size * 4 + b2_2d.size * 4 + n_pad * D * 4),
    )

    out = pl.pallas_call(
        _mlp_kernel,
        out_shape=jax.ShapeDtypeStruct((n_pad, D), jnp.float32),
        grid_spec=pltpu.PrefetchScalarGridSpec(
            num_scalar_prefetch=0,
            grid=(n_pad // tm, H // th),
            in_specs=[
                pl.BlockSpec((tm, D), lambda i, h: (i, 0)),   # x tile
                pl.BlockSpec((D, th), lambda i, h: (0, h)),   # W1 column slice
                pl.BlockSpec((1, th), lambda i, h: (0, h)),   # b1 slice
                pl.BlockSpec((th, D), lambda i, h: (h, 0)),   # W2 row slice
                pl.BlockSpec((1, D), lambda i, h: (0, 0)),    # b2
            ],
            out_specs=pl.BlockSpec((tm, D), lambda i, h: (i, 0)),
            scratch_shapes=[pltpu.VMEM((tm, D), jnp.float32)],
        ),
        compiler_params=pltpu.CompilerParams(
            dimension_semantics=("parallel", "arbitrary"),
            vmem_limit_bytes=_VMEM_LIMIT,
        ),
        cost_estimate=cost,
    )(x_p, w1_b, b1_2d, w2_b, b2_2d)
    return out[:N]


# ----------------------------------------------------------------------------
# Generic Linear: y = x @ W + b   (QKV projection, attention output projection)
# ----------------------------------------------------------------------------
def _linear_kernel(x_ref, w_ref, b_ref, o_ref):
    y = jnp.dot(x_ref[...], w_ref[...], preferred_element_type=jnp.float32)
    o_ref[...] = (y + b_ref[...]).astype(o_ref.dtype)


def linear_forward(x, w, b, *, tm=256):
    N, d_in = x.shape
    d_out = w.shape[1]
    tm = _pick_tile(N, tm)
    n_pad = _round_up(N, tm)

    x_p = _pad_rows(x, n_pad).astype(jnp.bfloat16)
    w_b = w.astype(jnp.bfloat16)
    b_2d = b.reshape(1, d_out).astype(jnp.float32)

    out = pl.pallas_call(
        _linear_kernel,
        out_shape=jax.ShapeDtypeStruct((n_pad, d_out), jnp.float32),
        grid_spec=pltpu.PrefetchScalarGridSpec(
            num_scalar_prefetch=0,
            grid=(n_pad // tm,),
            in_specs=[
                pl.BlockSpec((tm, d_in), lambda i: (i, 0)),
                pl.BlockSpec((d_in, d_out), lambda i: (0, 0)),
                pl.BlockSpec((1, d_out), lambda i: (0, 0)),
            ],
            out_specs=pl.BlockSpec((tm, d_out), lambda i: (i, 0)),
        ),
        compiler_params=pltpu.CompilerParams(
            dimension_semantics=("parallel",),
            vmem_limit_bytes=_VMEM_LIMIT,
        ),
    )(x_p, w_b, b_2d)
    return out[:N]


# ----------------------------------------------------------------------------
# LayerNorm over the embedding dimension (f32 throughout, eps=1e-5 as torch).
# ----------------------------------------------------------------------------
def _layernorm_kernel(x_ref, g_ref, b_ref, o_ref):
    x = x_ref[...].astype(jnp.float32)
    mean = jnp.mean(x, axis=-1, keepdims=True)
    xc = x - mean
    var = jnp.mean(xc * xc, axis=-1, keepdims=True)
    y = xc * lax.rsqrt(var + 1e-5) * g_ref[...] + b_ref[...]
    o_ref[...] = y.astype(o_ref.dtype)


def layernorm_forward(x, gamma, beta, *, tm=256):
    N, D = x.shape
    tm = _pick_tile(N, tm)
    n_pad = _round_up(N, tm)
    x_p = _pad_rows(x, n_pad)
    g_2d = gamma.reshape(1, D).astype(jnp.float32)
    b_2d = beta.reshape(1, D).astype(jnp.float32)

    out = pl.pallas_call(
        _layernorm_kernel,
        out_shape=jax.ShapeDtypeStruct((n_pad, D), jnp.float32),
        grid_spec=pltpu.PrefetchScalarGridSpec(
            num_scalar_prefetch=0,
            grid=(n_pad // tm,),
            in_specs=[
                pl.BlockSpec((tm, D), lambda i: (i, 0)),
                pl.BlockSpec((1, D), lambda i: (0, 0)),
                pl.BlockSpec((1, D), lambda i: (0, 0)),
            ],
            out_specs=pl.BlockSpec((tm, D), lambda i: (i, 0)),
        ),
        compiler_params=pltpu.CompilerParams(
            dimension_semantics=("parallel",),
            vmem_limit_bytes=_VMEM_LIMIT,
        ),
    )(x_p, g_2d, b_2d)
    return out[:N]


# ----------------------------------------------------------------------------
# Attention core, one (batch, head) per grid step.
# Matches the reference module exactly: softmax first, THEN divide by sqrt(embedding_dim).
# TODO(synk): for long sequences, tile the KV axis (flash-attention style) instead of
#             materializing the full (S, S) score matrix per head.
# ----------------------------------------------------------------------------
def _attention_kernel(q_ref, k_ref, v_ref, o_ref, *, scale):
    # q/k/v refs: (S, d_head) bf16 for one (batch, head).
    s = lax.dot_general(q_ref[...], k_ref[...],
                        (((1,), (1,)), ((), ())),
                        preferred_element_type=jnp.float32)      # (S, S)
    s = s - jnp.max(s, axis=-1, keepdims=True)
    e = jnp.exp(s)
    p = e / jnp.sum(e, axis=-1, keepdims=True)
    p = p * scale                                                # post-softmax scaling
    o = jnp.dot(p.astype(v_ref.dtype), v_ref[...],
                preferred_element_type=jnp.float32)              # (S, d_head)
    o_ref[...] = o.astype(o_ref.dtype)


def attention_forward(q, k, v, *, scale):
    """q, k, v: (B*heads, S, d_head) f32 -> (B*heads, S, d_head) f32."""
    bh, s_len, dh = q.shape
    qb, kb, vb = (a.astype(jnp.bfloat16) for a in (q, k, v))
    kern = functools.partial(_attention_kernel, scale=scale)

    def _spec():
        return pl.BlockSpec((None, s_len, dh), lambda i: (i, 0, 0))

    return pl.pallas_call(
        kern,
        out_shape=jax.ShapeDtypeStruct((bh, s_len, dh), jnp.float32),
        grid_spec=pltpu.PrefetchScalarGridSpec(
            num_scalar_prefetch=0,
            grid=(bh,),
            in_specs=[_spec(), _spec(), _spec()],
            out_specs=_spec(),
        ),
        compiler_params=pltpu.CompilerParams(
            dimension_semantics=("parallel",),
            vmem_limit_bytes=_VMEM_LIMIT,
        ),
    )(qb, kb, vb)


# ----------------------------------------------------------------------------
# Block / VisionTransformer glue (reshapes, residuals kept at the JAX level).
# ----------------------------------------------------------------------------
def _block_impl(x, p, num_heads, ln_fn, lin_fn, attn_fn, mlp_fn):
    B, S, D = x.shape
    dh = D // num_heads
    N = B * S
    x2d = x.reshape(N, D)

    # LayerNorm -> MultiHeadAttention -> residual
    h = ln_fn(x2d, p["ln1_g"], p["ln1_b"])
    qkv = lin_fn(h, p["w_qkv"], p["b_qkv"])                       # (N, 3D)
    # einops 'b n (h d qkv) -> (qkv) b h n d': h outer, d middle, qkv inner.
    qkv = qkv.reshape(B, S, num_heads, dh, 3)
    q = jnp.transpose(qkv[..., 0], (0, 2, 1, 3)).reshape(B * num_heads, S, dh)
    k = jnp.transpose(qkv[..., 1], (0, 2, 1, 3)).reshape(B * num_heads, S, dh)
    v = jnp.transpose(qkv[..., 2], (0, 2, 1, 3)).reshape(B * num_heads, S, dh)
    attn = attn_fn(q, k, v, scale=1.0 / math.sqrt(D))             # scale by 1/sqrt(embed_dim)
    attn = attn.reshape(B, num_heads, S, dh).transpose(0, 2, 1, 3).reshape(N, D)
    proj = lin_fn(attn, p["w_proj"], p["b_proj"])
    x2d = x2d + proj

    # LayerNorm -> MLP -> residual   (dropout p=0.0 is the identity)
    h = ln_fn(x2d, p["ln2_g"], p["ln2_b"])
    y = mlp_fn(h, p["w1"], p["b1"], p["w2"], p["b2"])
    x2d = x2d + y
    return x2d.reshape(B, S, D)


def vit_forward(x, params_list, *, num_heads):
    for p in params_list:
        x = _block_impl(x, p, num_heads, layernorm_forward, linear_forward,
                        attention_forward, mlp_forward)
    return x


# ----------------------------------------------------------------------------
# Pure-JAX reference mirroring the kernel's bf16-operand / f32-accumulate math.
# ----------------------------------------------------------------------------
def _linear_ref(x, w, b):
    return jnp.dot(x.astype(jnp.bfloat16), w.astype(jnp.bfloat16),
                   preferred_element_type=jnp.float32) + b


def _layernorm_ref(x, gamma, beta):
    mean = jnp.mean(x, axis=-1, keepdims=True)
    xc = x - mean
    var = jnp.mean(xc * xc, axis=-1, keepdims=True)
    return xc * lax.rsqrt(var + 1e-5) * gamma + beta


def _mlp_ref(x, w1, b1, w2, b2):
    h = _gelu_exact(_linear_ref(x, w1, b1))
    return _linear_ref(h, w2, b2)


def _attention_ref(q, k, v, *, scale):
    qb, kb, vb = (a.astype(jnp.bfloat16) for a in (q, k, v))
    s = jnp.einsum("bqd,bkd->bqk", qb, kb, preferred_element_type=jnp.float32)
    s = s - jnp.max(s, axis=-1, keepdims=True)
    e = jnp.exp(s)
    p = e / jnp.sum(e, axis=-1, keepdims=True)
    p = p * scale
    return jnp.einsum("bqk,bkd->bqd", p.astype(jnp.bfloat16), vb,
                      preferred_element_type=jnp.float32)


def vit_reference(x, params_list, *, num_heads):
    for p in params_list:
        x = _block_impl(x, p, num_heads, _layernorm_ref, _linear_ref,
                        _attention_ref, _mlp_ref)
    return x


# ----------------------------------------------------------------------------
# Parameter init matching torch defaults (Linear: U(+/-1/sqrt(fan_in)); LN: ones/zeros).
# ----------------------------------------------------------------------------
def init_block_params(key, embedding_dim, expansion_factor, num_heads):
    del num_heads  # heads only affect the reshape, not the parameter shapes
    D = embedding_dim
    H = D * expansion_factor
    ks = jax.random.split(key, 8)

    def linear_init(kw, kb, fan_in, fan_out):
        bound = 1.0 / math.sqrt(fan_in)
        w = jax.random.uniform(kw, (fan_in, fan_out), jnp.float32, -bound, bound)
        b = jax.random.uniform(kb, (fan_out,), jnp.float32, -bound, bound)
        return w, b

    w_qkv, b_qkv = linear_init(ks[0], ks[1], D, 3 * D)
    w_proj, b_proj = linear_init(ks[2], ks[3], D, D)
    w1, b1 = linear_init(ks[4], ks[5], D, H)
    w2, b2 = linear_init(ks[6], ks[7], H, D)
    return dict(
        ln1_g=jnp.ones((D,), jnp.float32), ln1_b=jnp.zeros((D,), jnp.float32),
        w_qkv=w_qkv, b_qkv=b_qkv, w_proj=w_proj, b_proj=b_proj,
        ln2_g=jnp.ones((D,), jnp.float32), ln2_b=jnp.zeros((D,), jnp.float32),
        w1=w1, b1=b1, w2=w2, b2=b2,
    )


if __name__ == "__main__":
    # Small shapes consistent with the module (real ViT: D=768, heads=8, depth=12).
    batch, seq, embedding_dim, expansion_factor, num_heads, depth = 2, 16, 64, 4, 8, 2

    key = jax.random.PRNGKey(0)
    kx, kp = jax.random.split(key)
    x = jax.random.normal(kx, (batch, seq, embedding_dim), jnp.float32)
    params = [init_block_params(k, embedding_dim, expansion_factor, num_heads)
              for k in jax.random.split(kp, depth)]

    vit = jax.jit(functools.partial(vit_forward, num_heads=num_heads))
    out = vit(x, params)
    jax.block_until_ready(out)

    ref = vit_reference(x, params, num_heads=num_heads)
    assert out.shape == (batch, seq, embedding_dim)
    assert bool(jnp.all(jnp.isfinite(out)))
    assert jnp.allclose(out, ref, atol=2e-2, rtol=2e-2), \
        float(jnp.max(jnp.abs(out - ref)))

    print("KERNEL_OK")
</pallas_src>

<mosaic_0001>
module attributes {stable_mosaic.version = 11 : i64} {
  func.func @_linear_kernel(%arg0: i32, %arg1: memref<32x64xbf16, #tpu.memory_space<vmem>>, %arg2: memref<64x192xbf16, #tpu.memory_space<vmem>>, %arg3: memref<1x192xf32, #tpu.memory_space<vmem>>, %arg4: memref<32x192xf32, #tpu.memory_space<vmem>>) attributes {dimension_semantics = [#tpu.dimension_semantics<parallel>], iteration_bounds = array<i64: 1>, scalar_prefetch = 0 : i64, scratch_operands = 0 : i64, tpu.core_type = #tpu.core_type<tc>, window_params = [{transform_indices = @transform_0, window_bounds = array<i64: 32, 64>}, {pipeline_mode = #tpu.pipeline_mode<synchronous>, transform_indices = @transform_1, window_bounds = array<i64: 64, 192>}, {pipeline_mode = #tpu.pipeline_mode<synchronous>, transform_indices = @transform_2, window_bounds = array<i64: 1, 192>}, {transform_indices = @transform_3, window_bounds = array<i64: 32, 192>}]} {
    %c0 = arith.constant 0 : index
    %c0_0 = arith.constant 0 : index
    %0 = vector.load %arg1[%c0, %c0_0] : memref<32x64xbf16, #tpu.memory_space<vmem>>, vector<32x64xbf16>
    %c0_1 = arith.constant 0 : index
    %c0_2 = arith.constant 0 : index
    %1 = vector.load %arg2[%c0_1, %c0_2] : memref<64x192xbf16, #tpu.memory_space<vmem>>, vector<64x192xbf16>
    %cst = arith.constant dense<0.000000e+00> : vector<32x192xf32>
    %2 = tpu.matmul %0, %1, %cst {dimension_numbers = #tpu.dot_dimension_numbers<[1], [0], [0], [1], [0, 0, 1, 1], [], []>} : vector<32x64xbf16>, vector<64x192xbf16>, vector<32x192xf32> -> vector<32x192xf32>
    %c0_3 = arith.constant 0 : index
    %c0_4 = arith.constant 0 : index
    %3 = vector.load %arg3[%c0_3, %c0_4] : memref<1x192xf32, #tpu.memory_space<vmem>>, vector<1x192xf32>
    %4 = vector.broadcast %3 : vector<1x192xf32> to vector<32x192xf32>
    %5 = arith.addf %2, %4 : vector<32x192xf32>
    %c0_5 = arith.constant 0 : index
    %c0_6 = arith.constant 0 : index
    %6 = vector.load %arg4[%c0_5, %c0_6] : memref<32x192xf32, #tpu.memory_space<vmem>>, vector<32x192xf32>
    tpu.vector_store %arg4[%c0_5, %c0_6], %5 {strides = array<i32>} : memref<32x192xf32, #tpu.memory_space<vmem>>, vector<32x192xf32>,
    return
  }
  func.func @transform_0(%arg0: i32) -> (i32, i32) {
    %c0_i32 = arith.constant 0 : i32
    %c0_i32_0 = arith.constant 0 : i32
    return %arg0, %c0_i32 : i32, i32
  }
  func.func @transform_1(%arg0: i32) -> (i32, i32) {
    %c0_i32 = arith.constant 0 : i32
    %c0_i32_0 = arith.constant 0 : i32
    %c0_i32_1 = arith.constant 0 : i32
    return %c0_i32, %c0_i32_0 : i32, i32
  }
  func.func @transform_2(%arg0: i32) -> (i32, i32) {
    %c0_i32 = arith.constant 0 : i32
    %c0_i32_0 = arith.constant 0 : i32
    %c0_i32_1 = arith.constant 0 : i32
    return %c0_i32, %c0_i32_0 : i32, i32
  }
  func.func @transform_3(%arg0: i32) -> (i32, i32) {
    %c0_i32 = arith.constant 0 : i32
    %c0_i32_0 = arith.constant 0 : i32
    return %arg0, %c0_i32 : i32, i32
  }
}

module attributes {stable_mosaic.version = 11 : i64} {
  func.func @_layernorm_kernel(%arg0: i32, %arg1: memref<32x64xf32, #tpu.memory_space<vmem>>, %arg2: memref<1x64xf32, #tpu.memory_space<vmem>>, %arg3: memref<1x64xf32, #tpu.memory_space<vmem>>, %arg4: memref<32x64xf32, #tpu.memory_space<vmem>>) attributes {dimension_semantics = [#tpu.dimension_semantics<parallel>], iteration_bounds = array<i64: 1>, scalar_prefetch = 0 : i64, scratch_operands = 0 : i64, tpu.core_type = #tpu.core_type<tc>, window_params = [{transform_indices = @transform_0, window_bounds = array<i64: 32, 64>}, {pipeline_mode = #tpu.pipeline_mode<synchronous>, transform_indices = @transform_1, window_bounds = array<i64: 1, 64>}, {pipeline_mode = #tpu.pipeline_mode<synchronous>, transform_indices = @transform_2, window_bounds = array<i64: 1, 64>}, {transform_indices = @transform_3, window_bounds = array<i64: 32, 64>}]} {
    %c0 = arith.constant 0 : index
    %c0_0 = arith.constant 0 : index
    %0 = vector.load %arg1[%c0, %c0_0] : memref<32x64xf32, #tpu.memory_space<vmem>>, vector<32x64xf32>
    %cst = arith.constant dense<0.000000e+00> : vector<32xf32>
    %1 = vector.multi_reduction <add>, %0, %cst [1] : vector<32x64xf32> to vector<32xf32>
    %2 = vector.shape_cast %1 : vector<32xf32> to vector<32x1xf32>
    %cst_1 = arith.constant 6.400000e+01 : f32
    %3 = vector.broadcast %cst_1 : f32 to vector<32x1xf32>
    %4 = arith.divf %2, %3 : vector<32x1xf32>
    %5 = vector.broadcast %4 : vector<32x1xf32> to vector<32x64xf32>
    %6 = arith.subf %0, %5 : vector<32x64xf32>
    %7 = arith.mulf %6, %6 : vector<32x64xf32>
    %cst_2 = arith.constant dense<0.000000e+00> : vector<32xf32>
    %8 = vector.multi_reduction <add>, %7, %cst_2 [1] : vector<32x64xf32> to vector<32xf32>
    %9 = vector.shape_cast %8 : vector<32xf32> to vector<32x1xf32>
    %cst_3 = arith.constant 6.400000e+01 : f32
    %10 = vector.broadcast %cst_3 : f32 to vector<32x1xf32>
    %11 = arith.divf %9, %10 : vector<32x1xf32>
    %cst_4 = arith.constant 9.99999974E-6 : f32
    %12 = vector.broadcast %cst_4 : f32 to vector<32x1xf32>
    %13 = arith.addf %11, %12 : vector<32x1xf32>
    %14 = math.rsqrt %13 : vector<32x1xf32>
    %15 = vector.broadcast %14 : vector<32x1xf32> to vector<32x64xf32>
    %16 = arith.mulf %6, %15 : vector<32x64xf32>
    %c0_5 = arith.constant 0 : index
    %c0_6 = arith.constant 0 : index
    %17 = vector.load %arg2[%c0_5, %c0_6] : memref<1x64xf32, #tpu.memory_space<vmem>>, vector<1x64xf32>
    %18 = vector.broadcast %17 : vector<1x64xf32> to vector<32x64xf32>
    %19 = arith.mulf %16, %18 : vector<32x64xf32>
    %c0_7 = arith.constant 0 : index
    %c0_8 = arith.constant 0 : index
    %20 = vector.load %arg3[%c0_7, %c0_8] : memref<1x64xf32, #tpu.memory_space<vmem>>, vector<1x64xf32>
    %21 = vector.broadcast %20 : vector<1x64xf32> to vector<32x64xf32>
    %22 = arith.addf %19, %21 : vector<32x64xf32>
    %c0_9 = arith.constant 0 : index
    %c0_10 = arith.constant 0 : index
    %23 = vector.load %arg4[%c0_9, %c0_10] : memref<32x64xf32, #tpu.memory_space<vmem>>, vector<32x64xf32>
    tpu.vector_store %arg4[%c0_9, %c0_10], %22 {strides = array<i32>} : memref<32x64xf32, #tpu.memory_space<vmem>>, vector<32x64xf32>,
    return
  }
  func.func @transform_0(%arg0: i32) -> (i32, i32) {
    %c0_i32 = arith.constant 0 : i32
    %c0_i32_0 = arith.constant 0 : i32
    return %arg0, %c0_i32 : i32, i32
  }
  func.func @transform_1(%arg0: i32) -> (i32, i32) {
    %c0_i32 = arith.constant 0 : i32
    %c0_i32_0 = arith.constant 0 : i32
    %c0_i32_1 = arith.constant 0 : i32
    return %c0_i32, %c0_i32_0 : i32, i32
  }
  func.func @transform_2(%arg0: i32) -> (i32, i32) {
    %c0_i32 = arith.constant 0 : i32
    %c0_i32_0 = arith.constant 0 : i32
    %c0_i32_1 = arith.constant 0 : i32
    return %c0_i32, %c0_i32_0 : i32, i32
  }
  func.func @transform_3(%arg0: i32) -> (i32, i32) {
    %c0_i32 = arith.constant 0 : i32
    %c0_i32_0 = arith.constant 0 : i32
    return %arg0, %c0_i32 : i32, i32
  }
}

module attributes {stable_mosaic.version = 11 : i64} {
  func.func @_attention_kernel(%arg0: i32, %arg1: memref<1x16x8xbf16, #tpu.memory_space<vmem>>, %arg2: memref<1x16x8xbf16, #tpu.memory_space<vmem>>, %arg3: memref<1x16x8xbf16, #tpu.memory_space<vmem>>, %arg4: memref<1x16x8xf32, #tpu.memory_space<vmem>>) attributes {dimension_semantics = [#tpu.dimension_semantics<parallel>], iteration_bounds = array<i64: 16>, scalar_prefetch = 0 : i64, scratch_operands = 0 : i64, tpu.core_type = #tpu.core_type<tc>, window_params = [{transform_indices = @transform_0, window_bounds = array<i64: 1, 16, 8>}, {transform_indices = @transform_1, window_bounds = array<i64: 1, 16, 8>}, {transform_indices = @transform_2, window_bounds = array<i64: 1, 16, 8>}, {transform_indices = @transform_3, window_bounds = array<i64: 1, 16, 8>}]} {
    %c0 = arith.constant 0 : index
    %c0_0 = arith.constant 0 : index
    %c0_1 = arith.constant 0 : index
    %0 = vector.load %arg1[%c0, %c0_0, %c0_1] : memref<1x16x8xbf16, #tpu.memory_space<vmem>>, vector<1x16x8xbf16>
    %1 = vector.shape_cast %0 : vector<1x16x8xbf16> to vector<16x8xbf16>
    %c0_2 = arith.constant 0 : index
    %c0_3 = arith.constant 0 : index
    %c0_4 = arith.constant 0 : index
    %2 = vector.load %arg2[%c0_2, %c0_3, %c0_4] : memref<1x16x8xbf16, #tpu.memory_space<vmem>>, vector<1x16x8xbf16>
    %3 = vector.shape_cast %2 : vector<1x16x8xbf16> to vector<16x8xbf16>
    %cst = arith.constant dense<0.000000e+00> : vector<16x16xf32>
    %4 = tpu.matmul %1, %3, %cst {dimension_numbers = #tpu.dot_dimension_numbers<[1], [1], [0], [0], [0, 0, 1, 0], [], []>} : vector<16x8xbf16>, vector<16x8xbf16>, vector<16x16xf32> -> vector<16x16xf32>
    %cst_5 = arith.constant dense<0xFF800000> : vector<16xf32>
    %5 = vector.multi_reduction <maximumf>, %4, %cst_5 [1] : vector<16x16xf32> to vector<16xf32>
    %6 = vector.shape_cast %5 : vector<16xf32> to vector<16x1xf32>
    %7 = vector.broadcast %6 : vector<16x1xf32> to vector<16x16xf32>
    %8 = arith.subf %4, %7 : vector<16x16xf32>
    %9 = math.exp %8 : vector<16x16xf32>
    %cst_6 = arith.constant dense<0.000000e+00> : vector<16xf32>
    %10 = vector.multi_reduction <add>, %9, %cst_6 [1] : vector<16x16xf32> to vector<16xf32>
    %11 = vector.shape_cast %10 : vector<16xf32> to vector<16x1xf32>
    %12 = vector.broadcast %11 : vector<16x1xf32> to vector<16x16xf32>
    %13 = arith.divf %9, %12 : vector<16x16xf32>
    %cst_7 = arith.constant 1.250000e-01 : f32
    %14 = vector.broadcast %cst_7 : f32 to vector<16x16xf32>
    %15 = arith.mulf %13, %14 : vector<16x16xf32>
    %16 = arith.truncf %15 : vector<16x16xf32> to vector<16x16xbf16>
    %c0_8 = arith.constant 0 : index
    %c0_9 = arith.constant 0 : index
    %c0_10 = arith.constant 0 : index
    %17 = vector.load %arg3[%c0_8, %c0_9, %c0_10] : memref<1x16x8xbf16, #tpu.memory_space<vmem>>, vector<1x16x8xbf16>
    %18 = vector.shape_cast %17 : vector<1x16x8xbf16> to vector<16x8xbf16>
    %cst_11 = arith.constant dense<0.000000e+00> : vector<16x8xf32>
    %19 = tpu.matmul %16, %18, %cst_11 {dimension_numbers = #tpu.dot_dimension_numbers<[1], [0], [0], [1], [0, 0, 1, 1], [], []>} : vector<16x16xbf16>, vector<16x8xbf16>, vector<16x8xf32> -> vector<16x8xf32>
    %c0_12 = arith.constant 0 : index
    %c0_13 = arith.constant 0 : index
    %c0_14 = arith.constant 0 : index
    %20 = vector.load %arg4[%c0_12, %c0_13, %c0_14] : memref<1x16x8xf32, #tpu.memory_space<vmem>>, vector<1x16x8xf32>
    %21 = vector.shape_cast %20 : vector<1x16x8xf32> to vector<16x8xf32>
    %22 = vector.shape_cast %19 : vector<16x8xf32> to vector<1x16x8xf32>
    tpu.vector_store %arg4[%c0_12, %c0_13, %c0_14], %22 {strides = array<i32>} : memref<1x16x8xf32, #tpu.memory_space<vmem>>, vector<1x16x8xf32>,
    return
  }
  func.func @transform_0(%arg0: i32) -> (i32, i32, i32) {
    %c0_i32 = arith.constant 0 : i32
    %c0_i32_0 = arith.constant 0 : i32
    %c0_i32_1 = arith.constant 0 : i32
    return %arg0, %c0_i32, %c0_i32_0 : i32, i32, i32
  }
  func.func @transform_1(%arg0: i32) -> (i32, i32, i32) {
    %c0_i32 = arith.constant 0 : i32
    %c0_i32_0 = arith.constant 0 : i32
    %c0_i32_1 = arith.constant 0 : i32
    return %arg0, %c0_i32, %c0_i32_0 : i32, i32, i32
  }
  func.func @transform_2(%arg0: i32) -> (i32, i32, i32) {
    %c0_i32 = arith.constant 0 : i32
    %c0_i32_0 = arith.constant 0 : i32
    %c0_i32_1 = arith.constant 0 : i32
    return %arg0, %c0_i32, %c0_i32_0 : i32, i32, i32
  }
  func.func @transform_3(%arg0: i32) -> (i32, i32, i32) {
    %c0_i32 = arith.constant 0 : i32
    %c0_i32_0 = arith.constant 0 : i32
    %c0_i32_1 = arith.constant 0 : i32
    return %arg0, %c0_i32, %c0_i32_0 : i32, i32, i32
  }
}

module attributes {stable_mosaic.version = 11 : i64} {
  func.func @_linear_kernel(%arg0: i32, %arg1: memref<32x64xbf16, #tpu.memory_space<vmem>>, %arg2: memref<64x64xbf16, #tpu.memory_space<vmem>>, %arg3: memref<1x64xf32, #tpu.memory_space<vmem>>, %arg4: memref<32x64xf32, #tpu.memory_space<vmem>>) attributes {dimension_semantics = [#tpu.dimension_semantics<parallel>], iteration_bounds = array<i64: 1>, scalar_prefetch = 0 : i64, scratch_operands = 0 : i64, tpu.core_type = #tpu.core_type<tc>, window_params = [{transform_indices = @transform_0, window_bounds = array<i64: 32, 64>}, {pipeline_mode = #tpu.pipeline_mode<synchronous>, transform_indices = @transform_1, window_bounds = array<i64: 64, 64>}, {pipeline_mode = #tpu.pipeline_mode<synchronous>, transform_indices = @transform_2, window_bounds = array<i64: 1, 64>}, {transform_indices = @transform_3, window_bounds = array<i64: 32, 64>}]} {
    %c0 = arith.constant 0 : index
    %c0_0 = arith.constant 0 : index
    %0 = vector.load %arg1[%c0, %c0_0] : memref<32x64xbf16, #tpu.memory_space<vmem>>, vector<32x64xbf16>
    %c0_1 = arith.constant 0 : index
    %c0_2 = arith.constant 0 : index
    %1 = vector.load %arg2[%c0_1, %c0_2] : memref<64x64xbf16, #tpu.memory_space<vmem>>, vector<64x64xbf16>
    %cst = arith.constant dense<0.000000e+00> : vector<32x64xf32>
    %2 = tpu.matmul %0, %1, %cst {dimension_numbers = #tpu.dot_dimension_numbers<[1], [0], [0], [1], [0, 0, 1, 1], [], []>} : vector<32x64xbf16>, vector<64x64xbf16>, vector<32x64xf32> -> vector<32x64xf32>
    %c0_3 = arith.constant 0 : index
    %c0_4 = arith.constant 0 : index
    %3 = vector.load %arg3[%c0_3, %c0_4] : memref<1x64xf32, #tpu.memory_space<vmem>>, vector<1x64xf32>
    %4 = vector.broadcast %3 : vector<1x64xf32> to vector<32x64xf32>
    %5 = arith.addf %2, %4 : vector<32x64xf32>
    %c0_5 = arith.constant 0 : index
    %c0_6 = arith.constant 0 : index
    %6 = vector.load %arg4[%c0_5, %c0_6] : memref<32x64xf32, #tpu.memory_space<vmem>>, vector<32x64xf32>
    tpu.vector_store %arg4[%c0_5, %c0_6], %5 {strides = array<i32>} : memref<32x64xf32, #tpu.memory_space<vmem>>, vector<32x64xf32>,
    return
  }
  func.func @transform_0(%arg0: i32) -> (i32, i32) {
    %c0_i32 = arith.constant 0 : i32
    %c0_i32_0 = arith.constant 0 : i32
    return %arg0, %c0_i32 : i32, i32
  }
  func.func @transform_1(%arg0: i32) -> (i32, i32) {
    %c0_i32 = arith.constant 0 : i32
    %c0_i32_0 = arith.constant 0 : i32
    %c0_i32_1 = arith.constant 0 : i32
    return %c0_i32, %c0_i32_0 : i32, i32
  }
  func.func @transform_2(%arg0: i32) -> (i32, i32) {
    %c0_i32 = arith.constant 0 : i32
    %c0_i32_0 = arith.constant 0 : i32
    %c0_i32_1 = arith.constant 0 : i32
    return %c0_i32, %c0_i32_0 : i32, i32
  }
  func.func @transform_3(%arg0: i32) -> (i32, i32) {
    %c0_i32 = arith.constant 0 : i32
    %c0_i32_0 = arith.constant 0 : i32
    return %arg0, %c0_i32 : i32, i32
  }
}

module attributes {stable_mosaic.version = 11 : i64} {
  func.func @_mlp_kernel(%arg0: i32, %arg1: i32, %arg2: memref<32x64xbf16, #tpu.memory_space<vmem>>, %arg3: memref<64x256xbf16, #tpu.memory_space<vmem>>, %arg4: memref<1x256xf32, #tpu.memory_space<vmem>>, %arg5: memref<256x64xbf16, #tpu.memory_space<vmem>>, %arg6: memref<1x64xf32, #tpu.memory_space<vmem>>, %arg7: memref<32x64xf32, #tpu.memory_space<vmem>>, %arg8: memref<32x64xf32, #tpu.memory_space<vmem>>) attributes {dimension_semantics = [#tpu.dimension_semantics<parallel>, #tpu.dimension_semantics<arbitrary>], iteration_bounds = array<i64: 1, 1>, scalar_prefetch = 0 : i64, scratch_operands = 1 : i64, tpu.core_type = #tpu.core_type<tc>, window_params = [{transform_indices = @transform_0, window_bounds = array<i64: 32, 64>}, {transform_indices = @transform_1, window_bounds = array<i64: 64, 256>}, {transform_indices = @transform_2, window_bounds = array<i64: 1, 256>}, {transform_indices = @transform_3, window_bounds = array<i64: 256, 64>}, {pipeline_mode = #tpu.pipeline_mode<synchronous>, transform_indices = @transform_4, window_bounds = array<i64: 1, 64>}, {transform_indices = @transform_5, window_bounds = array<i64: 32, 64>}]} {
    %c0_i32 = arith.constant 0 : i32
    %0 = arith.cmpi eq, %arg1, %c0_i32 : i32
    %1 = arith.extui %0 : i1 to i32
    %c0_i32_0 = arith.constant 0 : i32
    %2 = arith.cmpi ne, %1, %c0_i32_0 : i32
    scf.if %2 {
      %cst_18 = arith.constant 0.000000e+00 : f32
      %26 = vector.broadcast %cst_18 : f32 to vector<32x64xf32>
      %c0_19 = arith.constant 0 : index
      %c0_20 = arith.constant 0 : index
      %27 = vector.load %arg8[%c0_19, %c0_20] : memref<32x64xf32, #tpu.memory_space<vmem>>, vector<32x64xf32>
      tpu.vector_store %arg8[%c0_19, %c0_20], %26 {strides = array<i32>} : memref<32x64xf32, #tpu.memory_space<vmem>>, vector<32x64xf32>,
    } else {
    }
    %c0 = arith.constant 0 : index
    %c0_1 = arith.constant 0 : index
    %3 = vector.load %arg2[%c0, %c0_1] : memref<32x64xbf16, #tpu.memory_space<vmem>>, vector<32x64xbf16>
    %c0_2 = arith.constant 0 : index
    %c0_3 = arith.constant 0 : index
    %4 = vector.load %arg3[%c0_2, %c0_3] : memref<64x256xbf16, #tpu.memory_space<vmem>>, vector<64x256xbf16>
    %cst = arith.constant dense<0.000000e+00> : vector<32x256xf32>
    %5 = tpu.matmul %3, %4, %cst {dimension_numbers = #tpu.dot_dimension_numbers<[1], [0], [0], [1], [0, 0, 1, 1], [], []>} : vector<32x64xbf16>, vector<64x256xbf16>, vector<32x256xf32> -> vector<32x256xf32>
    %c0_4 = arith.constant 0 : index
    %c0_5 = arith.constant 0 : index
    %6 = vector.load %arg4[%c0_4, %c0_5] : memref<1x256xf32, #tpu.memory_space<vmem>>, vector<1x256xf32>
    %7 = vector.broadcast %6 : vector<1x256xf32> to vector<32x256xf32>
    %8 = arith.addf %5, %7 : vector<32x256xf32>
    %cst_6 = arith.constant 5.000000e-01 : f32
    %9 = vector.broadcast %cst_6 : f32 to vector<32x256xf32>
    %10 = arith.mulf %9, %8 : vector<32x256xf32>
    %cst_7 = arith.constant 0.707106769 : f32
    %11 = vector.broadcast %cst_7 : f32 to vector<32x256xf32>
    %12 = arith.mulf %8, %11 : vector<32x256xf32>
    %13 = math.erf %12 : vector<32x256xf32>
    %cst_8 = arith.constant 1.000000e+00 : f32
    %14 = vector.broadcast %cst_8 : f32 to vector<32x256xf32>
    %15 = arith.addf %14, %13 : vector<32x256xf32>
    %16 = arith.mulf %10, %15 : vector<32x256xf32>
    %c0_9 = arith.constant 0 : index
    %c0_10 = arith.constant 0 : index
    %17 = vector.load %arg8[%c0_9, %c0_10] : memref<32x64xf32, #tpu.memory_space<vmem>>, vector<32x64xf32>
    %18 = arith.truncf %16 : vector<32x256xf32> to vector<32x256xbf16>
    %c0_11 = arith.constant 0 : index
    %c0_12 = arith.constant 0 : index
    %19 = vector.load %arg5[%c0_11, %c0_12] : memref<256x64xbf16, #tpu.memory_space<vmem>>, vector<256x64xbf16>
    %cst_13 = arith.constant dense<0.000000e+00> : vector<32x64xf32>
    %20 = tpu.matmul %18, %19, %cst_13 {dimension_numbers = #tpu.dot_dimension_numbers<[1], [0], [0], [1], [0, 0, 1, 1], [], []>} : vector<32x256xbf16>, vector<256x64xbf16>, vector<32x64xf32> -> vector<32x64xf32>
    %21 = arith.addf %17, %20 : vector<32x64xf32>
    %c0_14 = arith.constant 0 : index
    %c0_15 = arith.constant 0 : index
    %22 = vector.load %arg8[%c0_14, %c0_15] : memref<32x64xf32, #tpu.memory_space<vmem>>, vector<32x64xf32>
    tpu.vector_store %arg8[%c0_14, %c0_15], %21 {strides = array<i32>} : memref<32x64xf32, #tpu.memory_space<vmem>>, vector<32x64xf32>,
    %c0_i32_16 = arith.constant 0 : i32
    %23 = arith.cmpi eq, %arg1, %c0_i32_16 : i32
    %24 = arith.extui %23 : i1 to i32
    %c0_i32_17 = arith.constant 0 : i32
    %25 = arith.cmpi ne, %24, %c0_i32_17 : i32
    scf.if %25 {
      %c0_18 = arith.constant 0 : index
      %c0_19 = arith.constant 0 : index
      %26 = vector.load %arg8[%c0_18, %c0_19] : memref<32x64xf32, #tpu.memory_space<vmem>>, vector<32x64xf32>
      %c0_20 = arith.constant 0 : index
      %c0_21 = arith.constant 0 : index
      %27 = vector.load %arg6[%c0_20, %c0_21] : memref<1x64xf32, #tpu.memory_space<vmem>>, vector<1x64xf32>
      %28 = vector.broadcast %27 : vector<1x64xf32> to vector<32x64xf32>
      %29 = arith.addf %26, %28 : vector<32x64xf32>
      %c0_22 = arith.constant 0 : index
      %c0_23 = arith.constant 0 : index
      %30 = vector.load %arg7[%c0_22, %c0_23] : memref<32x64xf32, #tpu.memory_space<vmem>>, vector<32x64xf32>
      tpu.vector_store %arg7[%c0_22, %c0_23], %29 {strides = array<i32>} : memref<32x64xf32, #tpu.memory_space<vmem>>, vector<32x64xf32>,
    } else {
    }
    return
  }
  func.func @transform_0(%arg0: i32, %arg1: i32) -> (i32, i32) {
    %c0_i32 = arith.constant 0 : i32
    %c0_i32_0 = arith.constant 0 : i32
    return %arg0, %c0_i32 : i32, i32
  }
  func.func @transform_1(%arg0: i32, %arg1: i32) -> (i32, i32) {
    %c0_i32 = arith.constant 0 : i32
    %c0_i32_0 = arith.constant 0 : i32
    return %c0_i32, %arg1 : i32, i32
  }
  func.func @transform_2(%arg0: i32, %arg1: i32) -> (i32, i32) {
    %c0_i32 = arith.constant 0 : i32
    %c0_i32_0 = arith.constant 0 : i32
    return %c0_i32, %arg1 : i32, i32
  }
  func.func @transform_3(%arg0: i32, %arg1: i32) -> (i32, i32) {
    %c0_i32 = arith.constant 0 : i32
    %c0_i32_0 = arith.constant 0 : i32
    return %arg1, %c0_i32 : i32, i32
  }
  func.func @transform_4(%arg0: i32, %arg1: i32) -> (i32, i32) {
    %c0_i32 = arith.constant 0 : i32
    %c0_i32_0 = arith.constant 0 : i32
    %c0_i32_1 = arith.constant 0 : i32
    return %c0_i32, %c0_i32_0 : i32, i32
  }
  func.func @transform_5(%arg0: i32, %arg1: i32) -> (i32, i32) {
    %c0_i32 = arith.constant 0 : i32
    %c0_i32_0 = arith.constant 0 : i32
    return %arg0, %c0_i32 : i32, i32
  }
}

</mosaic_0001>

<bundles_post_ra>
// kernel: vit_forward.12
= control target key start
LH: loop header
LB: loop body
LE: loop exit
PB: predicated region body
PF: predicated region fallthrough
CT: control target
= control target key end

     0   :  { %vm18_vm0 = vcmask 523264   ;;  %s174_s0 = inlined_call_operand.vmem [shape: f32[32,64], index: 0, kind: input, shape index: {}]   ;;  %s175_s1 = inlined_call_operand.vmem [shape: f32[1,64], index: 1, kind: input, shape index: {}]   ;;  %s176_s2 = inlined_call_operand.vmem [shape: f32[1,64], index: 2, kind: input, shape index: {}]   ;;  %s177_s3 = inlined_call_operand.vmem [shape: f32[32,64], index: 3, kind: output, shape index: {}]  }
   0x1   :  { %v14_v0 = vld [vmem:[%s174_s0] sm:$0xff]  ;;  %v16_v1 = vld [vmem:[%s174_s0 + $0x10] sm:$0xff]  ;;  %v15_v2 = vld [vmem:[%s174_s0 + $0x8] sm:$0xff] }
   0x2   :  { %v19_v3 = vsel %vm18_vm0, %v14_v0, 0.0  ;;  %v25_v4 = vsel %vm18_vm0, %v16_v1, 0.0  ;;  %v17_v5 = vld [vmem:[%s174_s0 + $0x18] sm:$0xff]  ;;  %v22_v6 = vsel %vm18_vm0, %v15_v2, 0.0  ;;  %v102_v41 = vld [vmem:[%s175_s1] ss:$0 sm:$0xff] }
   0x3   :  { %20 = vadd.xlane.f32.xlu0 %v19_v3  ;;  %26 = vadd.xlane.f32.xlu1 %v25_v4  ;;  %v28_v7 = vsel %vm18_vm0, %v17_v5, 0.0  ;;  %v103_v43 = vld [vmem:[%s176_s2] ss:$0 sm:$0xff] }
   0x7   :  { %23 = vadd.xlane.f32.xlu0 %v22_v6  ;;  %29 = vadd.xlane.f32.xlu1 %v28_v7 }
  0x90   :  { %v21_v8 = vpop.xlane.xlu0 %20  ;;  %v27_v9 = vpop.xlane.xlu1 %26 }
  0x91   :  { %v32_v10 = vmul.f32 0.015625, %v21_v8  ;;  %v34_v11 = vmul.f32 0.015625, %v27_v9 }
  0x93   :  { %v36_v12 = vsub.f32 %v14_v0, %v32_v10  ;;  %v38_v13 = vsub.f32 %v16_v1, %v34_v11 }
  0x94   :  { %v24_v14 = vpop.xlane.xlu0 %23  ;;  %v30_v15 = vpop.xlane.xlu1 %29 }
  0x95   :  { %v33_v16 = vmul.f32 0.015625, %v24_v14  ;;  %v35_v17 = vmul.f32 0.015625, %v30_v15  ;;  %v40_v18 = vmul.f32 %v36_v12, %v36_v12  ;;  %v42_v19 = vmul.f32 %v38_v13, %v38_v13 }
  0x97   :  { %v37_v20 = vsub.f32 %v15_v2, %v33_v16  ;;  %v39_v21 = vsub.f32 %v17_v5, %v35_v17  ;;  %v44_v22 = vsel %vm18_vm0, %v40_v18, 0.0  ;;  %v50_v23 = vsel %vm18_vm0, %v42_v19, 0.0 }
  0x98   :  { %45 = vadd.xlane.f32.xlu0 %v44_v22 }
  0x99   :  { %v41_v24 = vmul.f32 %v37_v20, %v37_v20  ;;  %v43_v25 = vmul.f32 %v39_v21, %v39_v21 }
  0x9b   :  { %v47_v26 = vsel %vm18_vm0, %v41_v24, 0.0  ;;  %v53_v27 = vsel %vm18_vm0, %v43_v25, 0.0 }
  0x9c   :  { %51 = vadd.xlane.f32.xlu0 %v50_v23  ;;  %48 = vadd.xlane.f32.xlu1 %v47_v26 }
  0xa0   :  { %54 = vadd.xlane.f32.xlu1 %v53_v27 }
 0x125   :  { %v46_v28 = vpop.xlane.xlu0 %45 }
 0x126   :  { %v56_v29 = vmul.f32 0.015625, %v46_v28 }
 0x128   :  { %v60_v30 = vadd.f32 1e-05, %v56_v29 }
 0x129   :  { %v49_v31 = vpop.xlane.xlu1 %48  ;;  %v52_v32 = vpop.xlane.xlu0 %51 }
 0x12a   :  { %104 = vrsqrt.f32 %v60_v30  ;;  %v57_v33 = vmul.f32 0.015625, %v49_v31  ;;  %v58_v34 = vmul.f32 0.015625, %v52_v32 }
 0x12c   :  { %v61_v35 = vadd.f32 1e-05, %v57_v33  ;;  %v62_v36 = vadd.f32 1e-05, %v58_v34 }
 0x12d   :  { %v55_v37 = vpop.xlane.xlu1 %54 }
 0x12e   :  { %106 = vrsqrt.f32 %v61_v35  ;;  %v59_v38 = vmul.f32 0.015625, %v55_v37 }
 0x12f   :  { %108 = vrsqrt.f32 %v62_v36 }
 0x130   :  { %v63_v39 = vadd.f32 1e-05, %v59_v38 }
 0x132   :  { %110 = vrsqrt.f32 %v63_v39 }
 0x134   :  { %v105_v40 = vpop.eup %104 }
 0x135   :  { %v68_v42 = vmul.f32 %v105_v40, %v36_v12 }
 0x137   :  { %v79_v44 = vmul.f32 %v102_v41, %v68_v42 }
 0x138   :  { %v107_v45 = vpop.eup %106 }
 0x139   :  { %v109_v46 = vpop.eup %108  ;;  %v90_v47 = vadd.f32 %v103_v43, %v79_v44  ;;  %v69_v48 = vmul.f32 %v107_v45, %v37_v20 }
 0x13a   :  { %v70_v49 = vmul.f32 %v109_v46, %v38_v13 }
 0x13b   :  { %94 = vst.msk [vmem:[%s177_s3] sm:$0xff] %vm18_vm0, %v90_v47  ;;  %v80_v50 = vmul.f32 %v102_v41, %v69_v48 }
 0x13c   :  { %v111_v51 = vpop.eup %110  ;;  %v81_v52 = vmul.f32 %v102_v41, %v70_v49 }
 0x13d   :  { %v91_v53 = vadd.f32 %v103_v43, %v80_v50  ;;  %v71_v54 = vmul.f32 %v111_v51, %v39_v21 }
 0x13e   :  { %v92_v55 = vadd.f32 %v103_v43, %v81_v52 }
 0x13f   :  { %95 = vst.msk [vmem:[%s177_s3 + $0x8] sm:$0xff] %vm18_vm0, %v91_v53  ;;  %v82_v56 = vmul.f32 %v102_v41, %v71_v54 }
 0x140   :  { %96 = vst.msk [vmem:[%s177_s3 + $0x10] sm:$0xff] %vm18_vm0, %v92_v55 }
 0x141   :  { %v93_v57 = vadd.f32 %v103_v43, %v82_v56 }
 0x143   :  { %97 = vst.msk [vmem:[%s177_s3 + $0x18] sm:$0xff] %vm18_vm0, %v93_v57 }

// kernel: vit_forward.13
= control target key start
LH: loop header
LB: loop body
LE: loop exit
PB: predicated region body
PF: predicated region fallthrough
CT: control target
= control target key end

     0   :  { %v196_v1 = vmov 0   ;;  %vm89_vm0 = vcmask 523264   ;;  %v29_v11 = vlaneseq  ;;  %s280_s1 = inlined_call_operand.vmem [shape: bf16[64,192], index: 1, kind: input, shape index: {}]   ;;  %s281_s0 = inlined_call_operand.vmem [shape: bf16[32,64], index: 0, kind: input, shape index: {}]   ;;  %s282_s2 = inlined_call_operand.vmem [shape: f32[1,192], index: 2, kind: input, shape index: {}]   ;;  %s283_s3 = inlined_call_operand.vmem [shape: f32[32,192], index: 3, kind: output, shape index: {}]  }
   0x1   :  { %v182_v0 = vld [vmem:[%s280_s1 + $0x4] ss:$8 sps:$4 sm:$0xff]   ;;  %128 = vmatprep.mubr.bf16.mxu0 %v196_v1  ;;  %138 = vmatprep.mubr.bf16.mxu1 %v196_v1  ;;  %v184_v2 = vld [vmem:[%s280_s1] ss:$8 sps:$4 sm:$0xff]   ;;  %v185_v3 = vld [vmem:[%s280_s1 + $0x14] ss:$8 sps:$4 sm:$0xff]  }
   0x2   :  { %96 = vmatprep.subr.bf16.mxu0 %v182_v0  ;;  %173 = vmatprep.subr.bf16.mxu1 %v182_v0  ;;  %v187_v4 = vld [vmem:[%s280_s1 + $0x10] ss:$8 sps:$4 sm:$0xff]   ;;  %v188_v5 = vld [vmem:[%s280_s1 + $0x24] ss:$8 sps:$4 sm:$0xff]   ;;  %v190_v6 = vld [vmem:[%s280_s1 + $0x20] ss:$8 sps:$4 sm:$0xff]  }
   0x3   :  { %97 = vmatpush1.bf16.msra.mxu0 %v184_v2  ;;  %177 = vmatpush1.bf16.msra.mxu1 %v184_v2  ;;  %v191_v7 = vld [vmem:[%s280_s1 + $0x34] ss:$8 sps:$4 sm:$0xff]   ;;  %v193_v8 = vld [vmem:[%s280_s1 + $0x30] ss:$8 sps:$4 sm:$0xff]   ;;  %v194_v9 = vld [vmem:[%s281_s0] sm:$0xff]   ;;  %v30_v12 = vshrl.u32 %v29_v11, 7 }
   0x4   :  { %98 = vmatprep.subr.bf16.mxu0 %v185_v3  ;;  %174 = vmatprep.subr.bf16.mxu1 %v185_v3  ;;  %v195_v10 = vld [vmem:[%s281_s0 + $0x8] sm:$0xff]   ;;  %v27_v14 = vld [vmem:[%s282_s2] sm:$0x3] }
   0x5   :  { %v31_v13 = vsub.s32 0, %v30_v12  ;;  %v35_v15 = vsub.s32 1, %v30_v12 }
   0x7   :  { %99 = vmatpush1.bf16.msra.mxu0 %v187_v4  ;;  %178 = vmatpush1.bf16.msra.mxu1 %v187_v4  ;;  %v32_v16 = vrot.slane %v27_v14, %v31_v13  ;;  %v36_v17 = vrot.slane %v27_v14, %v35_v15 }
   0x8   :  { %100 = vmatprep.subr.bf16.mxu0 %v188_v5  ;;  %175 = vmatprep.subr.bf16.mxu1 %v188_v5 }
   0xb   :  { %101 = vmatpush1.bf16.msra.mxu0 %v190_v6  ;;  %179 = vmatpush1.bf16.msra.mxu1 %v190_v6 }
   0xc   :  { %102 = vmatprep.subr.bf16.mxu0 %v191_v7  ;;  %176 = vmatprep.subr.bf16.mxu1 %v191_v7 }
   0xf   :  { %103 = vmatpush1.bf16.msra.mxu0 %v193_v8  ;;  %180 = vmatpush1.bf16.msra.mxu1 %v193_v8 }
  0x12   :  { %171 = vmatmul.mubr.msk.bf16.vlgmr.msra.gmra.mrb[0].mxu0 %vm89_vm0, %v194_v9  ;;  %172 = vmatmul.mubr.msk.bf16.vlgmr.msra.gmra.mrb[0].mxu1 %vm89_vm0, %v195_v10 }
  0xe5   :  { %v130_v18 = vpop.f32.mrb[0].mxu0  ;;  %v140_v19 = vpop.f32.mrb[0].mxu1 }
  0xe6   :  { %v131_v20 = vadd.f32 %v130_v18, %v32_v16  ;;  %v141_v21 = vadd.f32 %v140_v19, %v32_v16  ;;  %v132_v22 = vpop.f32.mrb[1].mxu0  ;;  %v142_v23 = vpop.f32.mrb[1].mxu1 }
  0xe7   :  { %v133_v24 = vadd.f32 %v132_v22, %v36_v17  ;;  %v143_v25 = vadd.f32 %v142_v23, %v36_v17  ;;  %v134_v26 = vpop.f32.mrb[2].mxu0  ;;  %v144_v27 = vpop.f32.mrb[2].mxu1 }
  0xe8   :  { %149 = vst [vmem:[%s283_s3] sm:$0xff] %v131_v20  ;;  %153 = vst [vmem:[%s283_s3 + $0x20] sm:$0xff] %v141_v21  ;;  %v135_v28 = vadd.f32 %v134_v26, %v32_v16  ;;  %v145_v29 = vadd.f32 %v144_v27, %v32_v16  ;;  %v136_v30 = vpop.f32.mrb[3].mxu0  ;;  %v146_v31 = vpop.f32.mrb[3].mxu1 }
  0xe9   :  { %150 = vst.msk [vmem:[%s283_s3 + $0x8] sm:$0xff] %vm89_vm0, %v133_v24  ;;  %154 = vst.msk [vmem:[%s283_s3 + $0x28] sm:$0xff] %vm89_vm0, %v143_v25  ;;  %v137_v32 = vadd.f32 %v136_v30, %v36_v17  ;;  %v147_v33 = vadd.f32 %v146_v31, %v36_v17 }
  0xea   :  { %151 = vst [vmem:[%s283_s3 + $0x10] sm:$0xff] %v135_v28  ;;  %155 = vst [vmem:[%s283_s3 + $0x30] sm:$0xff] %v145_v29 }
  0xeb   :  { %152 = vst.msk [vmem:[%s283_s3 + $0x18] sm:$0xff] %vm89_vm0, %v137_v32  ;;  %156 = vst.msk [vmem:[%s283_s3 + $0x38] sm:$0xff] %vm89_vm0, %v147_v33 }

// kernel: vit_forward.14
= control target key start
LH: loop header
LB: loop body
LE: loop exit
PB: predicated region body
PF: predicated region fallthrough
CT: control target
= control target key end

     0   :  { %s524_s12 = smov 0   ;;  %s565_s0 = inlined_call_operand.vmem [shape: bf16[16,16,8], index: 0, kind: input, shape index: {}]   ;;  %s566_s1 = inlined_call_operand.vmem [shape: bf16[16,16,8], index: 1, kind: input, shape index: {}]   ;;  %s567_s2 = inlined_call_operand.vmem [shape: bf16[16,16,8], index: 2, kind: input, shape index: {}]   ;;  %s568_s3 = inlined_call_operand.vmem [shape: f32[16,16,8], index: 3, kind: output, shape index: {}]  }
   0x1 LB: > { %s433_s13 = sadd.s32 4294967295, %s500_s12   ;;  %p437_p0 = scmp.ge.s32.totalorder %s500_s12, 1  ;;  %s500_s12 = sphi %s524_s12, %s13_s12  }
   0x2   : > { %p157_p1 = scmp.lt.s32.totalorder %s500_s12, 17 }
   0x4   : > { %p158_p2 = pnand %p437_p0, %p157_p1 }
   0x5   : > { %p191_p3 = scmp.lt.s32.totalorder (!%p158_p2), %s433_s13, 15  ;;  %v502_v0 = vmov (!%p158_p2), 0.0   ;;  %vm503_vm0 = vmmov (!%p158_p2), 0   ;;  %vm226_vm1 = vcmask (!%p158_p2), 64512   ;;  %vm274_vm2 = vcmask (!%p158_p2), 130048  }
   0x6   : > { %161 = sbr.rel (%p158_p2) target bundleno = 774 (0x306), region = 32  ;;  %461 = vmatprep.subr.bf16.mxu0 (!%p158_p2), %v502_v0  ;;  %463 = vmatprep.mubr.msk.bf16.mxu0 (!%p158_p2), %vm503_vm0, %v502_v0 }
   0x7   : > { %467 = vmatprep.subr.bf16.mxu1 (!%p158_p2), %v502_v0  ;;  %469 = vmatprep.mubr.msk.bf16.mxu1 (!%p158_p2), %vm503_vm0, %v502_v0 }
   0xd   : > { %s570_s13 = smov (!%p191_p3, %s433_s13), 15 }
   0xe   : > { %s535_s14 = sshll.u32 %s570_s13, 3  ;;  %s456_s24 = sshll.u32 %s570_s13, 4 }
   0xf   : > { %s200_s17 = scalar_lea.vmem %s566_s1, %s535_s14  ;;  %s195_s20 = scalar_lea.vmem %s565_s0, %s535_s14 }
  0x10   : > { %v483_v1 = vld [vmem:[%s200_s17] sm:$0xff]   ;;  %s205_s23 = scalar_lea.vmem %s567_s2, %s535_s14  ;;  %s210_s27 = scalar_lea.vmem %s568_s3, %s456_s24 }
  0x11   : > { %v231_v2 = vsel %vm226_vm1, %v483_v1, 0  ;;  %v484_v3 = vld [vmem:[%s195_s20] sm:$0xff]  }
  0x12   : > { %462 = vmatpush3.bf16.xpose.msra.mxu0 %v231_v2  ;;  %v485_v20 = vld [vmem:[%s205_s23] sm:$0xff]  }
  0x13   : > { %468 = vmatpush3.bf16.msra.mxu1 %v485_v20 }
  0x19   : > { %464 = vmatmul.mubr.msk.bf16.vlgmr.msra.gmra.mrb[0].mxu0 %vm226_vm1, %v484_v3 }
  0xec   : > { %v267_v4 = vpop.f32.mrb[0].mxu0 }
  0xed   : > { %v465_v5 = vpop.f32.mrb[1].mxu0  ;;  %v275_v6 = vsel %vm274_vm2, %v267_v4, -inf }
  0xee   : > { %276 = vmax.xlane.f32.xlu0 %v275_v6  ;;  %v270_v7 = vpop.f32.mrb[2].mxu0 }
  0xef   : > { %v466_v8 = vpop.f32.mrb[3].mxu0  ;;  %v278_v9 = vsel %vm274_vm2, %v270_v7, -inf }
  0xf2   : > { %279 = vmax.xlane.f32.xlu0 %v278_v9 }
 0x17b   : > { %v277_v10 = vpop.xlane.xlu0 %276 }
 0x17c   : > { %v281_v11 = vsub.f32 %v267_v4, %v277_v10 }
 0x17e   : > { %v283_v12 = vmul.f32 1.442695, %v281_v11 }
 0x17f   : > { %v280_v13 = vpop.xlane.xlu0 %279 }
 0x180   : > { %486 = vpow2.f32 %v283_v12  ;;  %v282_v14 = vsub.f32 %v270_v7, %v280_v13 }
 0x182   : > { %v285_v15 = vmul.f32 1.442695, %v282_v14 }
 0x184   : > { %488 = vpow2.f32 %v285_v15 }
 0x18a   : > { %v487_v16 = vpop.eup %486 }
 0x18b   : > { %v287_v17 = vsel %vm274_vm2, %v487_v16, 0.0 }
 0x18c   : > { %288 = vadd.xlane.f32.xlu1 %v287_v17 }
 0x18e   : > { %v489_v18 = vpop.eup %488 }
 0x18f   : > { %v290_v19 = vsel %vm274_vm2, %v489_v18, 0.0 }
 0x190   : > { %291 = vadd.xlane.f32.xlu1 %v290_v19 }
 0x219   : > { %v289_v21 = vpop.xlane.xlu1 %288 }
 0x21a   : > { %490 = vrcp.f32 %v289_v21 }
 0x21d   : > { %v292_v22 = vpop.xlane.xlu1 %291 }
 0x21e   : > { %492 = vrcp.f32 %v292_v22 }
 0x224   : > { %v491_v23 = vpop.eup %490 }
 0x225   : > { %v294_v24 = vmul.f32 %v491_v23, %v487_v16 }
 0x227   : > { %v297_v27 = vmul.f32 0.125, %v294_v24 }
 0x228   : > { %v493_v25 = vpop.eup %492 }
 0x229   : > { %v296_v26 = vmul.f32 %v493_v25, %v489_v18 }
 0x22b   : > { %v298_v28 = vmul.f32 0.125, %v296_v26 }
 0x22d   : > { %v299_v29 = vpack.c.bf16 %v298_v28, %v297_v27 }
 0x22f   : > { %470 = vmatmul.mubr.msk.bf16.vlgmr.msra.gmra.mrb[0].mxu1 %vm274_vm2, %v299_v29 }
 0x302   : > { %v345_v30 = vpop.f32.mrb[0].mxu1 }
 0x303   : > { %352 = vst.msk [vmem:[%s210_s27] sm:$0xff] %vm226_vm1, %v345_v30  ;;  %v471_v31 = vpop.f32.mrb[1].mxu1 }
 0x304   : > { %v348_v32 = vpop.f32.mrb[2].mxu1 }
 0x305   : > { %353 = vst.msk [vmem:[%s210_s27 + $0x8] sm:$0xff] %vm226_vm1, %v348_v32  ;;  %v472_v33 = vpop.f32.mrb[3].mxu1 }
 0x306 PF: > { %s13_s12 = sadd.s32 1, %s500_s12  }
 0x307   : > { %p10_p4 = scmp.ge.s32.totalorder %s13_s12, 18  }
 0x309   :  { %12 = sbr.rel (!%p10_p4) target bundleno = 1 (0x1), region = 68 }

// kernel: vit_forward.15
= control target key start
LH: loop header
LB: loop body
LE: loop exit
PB: predicated region body
PF: predicated region fallthrough
CT: control target
= control target key end

     0   :  { %vm68_vm0 = vcmask 523264   ;;  %s224_s1 = inlined_call_operand.vmem [shape: bf16[64,64], index: 1, kind: input, shape index: {}]   ;;  %s225_s0 = inlined_call_operand.vmem [shape: bf16[32,64], index: 0, kind: input, shape index: {}]   ;;  %s226_s2 = inlined_call_operand.vmem [shape: f32[1,64], index: 2, kind: input, shape index: {}]   ;;  %s227_s3 = inlined_call_operand.vmem [shape: f32[32,64], index: 3, kind: output, shape index: {}]  }
   0x1   :  { %v159_v0 = vld [vmem:[%s224_s1] sm:$0xff]   ;;  %v160_v1 = vld [vmem:[%s224_s1 + $0x8] sm:$0xff]   ;;  %v161_v2 = vld [vmem:[%s224_s1 + $0x10] sm:$0xff]  }
   0x2   :  { %147 = vmatprep.subr.bf16.mxu0 %v159_v0  ;;  %v163_v3 = vld [vmem:[%s225_s0] sm:$0xff]   ;;  %v162_v4 = vld [vmem:[%s224_s1 + $0x18] sm:$0xff]   ;;  %v164_v5 = vld [vmem:[%s225_s0 + $0x8] sm:$0xff]  }
   0x3   :  { %148 = vmatpush3.bf16.msra.mxu0 %v159_v0  ;;  %155 = vmatprep.mubr.msk.bf16.mxu0 %vm68_vm0, %v163_v3  ;;  %v132_v6 = vld [vmem:[%s226_s2] ss:$0 sm:$0xff] }
   0x4   :  { %149 = vmatprep.subr.bf16.mxu0 %v160_v1 }
   0x7   :  { %150 = vmatpush3.bf16.msra.mxu0 %v160_v1 }
   0x8   :  { %151 = vmatprep.subr.bf16.mxu0 %v161_v2 }
   0xb   :  { %152 = vmatpush3.bf16.msra.mxu0 %v161_v2 }
   0xc   :  { %153 = vmatprep.subr.bf16.mxu0 %v162_v4 }
   0xf   :  { %154 = vmatpush3.bf16.msra.mxu0 %v162_v4 }
  0x12   :  { %156 = vmatmul.mubr.msk.bf16.vlgmr.msra.gmra.mrb[0].mxu0 %vm68_vm0, %v164_v5 }
  0xe5   :  { %v157_v7 = vpop.f32.mrb[0].mxu0 }
  0xe6   :  { %v118_v8 = vadd.f32 %v157_v7, %v132_v6  ;;  %v109_v9 = vpop.f32.mrb[1].mxu0 }
  0xe7   :  { %v110_v10 = vadd.f32 %v132_v6, %v109_v9  ;;  %v158_v11 = vpop.f32.mrb[2].mxu0 }
  0xe8   :  { %126 = vst.msk [vmem:[%s227_s3 + $0x10] sm:$0xff] %vm68_vm0, %v118_v8  ;;  %v121_v12 = vadd.f32 %v158_v11, %v132_v6  ;;  %v112_v13 = vpop.f32.mrb[3].mxu0 }
  0xe9   :  { %124 = vst.msk [vmem:[%s227_s3] sm:$0xff] %vm68_vm0, %v110_v10  ;;  %v113_v14 = vadd.f32 %v132_v6, %v112_v13 }
  0xea   :  { %127 = vst.msk [vmem:[%s227_s3 + $0x18] sm:$0xff] %vm68_vm0, %v121_v12 }
  0xeb   :  { %125 = vst.msk [vmem:[%s227_s3 + $0x8] sm:$0xff] %vm68_vm0, %v113_v14 }

// kernel: vit_forward.17
= control target key start
LH: loop header
LB: loop body
LE: loop exit
PB: predicated region body
PF: predicated region fallthrough
CT: control target
= control target key end

     0   :  { %v528_v1 = vmov 0   ;;  %vm25_vm0 = vcmask 523264   ;;  %v44_v27 = vlaneseq  ;;  %s670_s1 = inlined_call_operand.vmem [shape: bf16[64,256], index: 1, kind: input, shape index: {}]   ;;  %s671_s0 = inlined_call_operand.vmem [shape: bf16[32,64], index: 0, kind: input, shape index: {}]   ;;  %s672_s3 = inlined_call_operand.vmem [shape: bf16[256,64], index: 3, kind: input, shape index: {}]   ;;  %s673_s2 = inlined_call_operand.vmem [shape: f32[1,256], index: 2, kind: input, shape index: {}]   ;;  %s674_s4 = inlined_call_operand.vmem [shape: f32[1,64], index: 4, kind: input, shape index: {}]   ;;  %s675_s5 = inlined_call_operand.vmem [shape: f32[32,64], index: 5, kind: output, shape index: {}]  }
   0x1   :  { %v482_v0 = vld [vmem:[%s670_s1 + $0x4] ss:$8 sps:$4 sm:$0xff]   ;;  %143 = vmatprep.mubr.bf16.mxu0 %v528_v1  ;;  %v484_v2 = vld [vmem:[%s670_s1] ss:$8 sps:$4 sm:$0xff]   ;;  %v485_v3 = vld [vmem:[%s670_s1 + $0x14] ss:$8 sps:$4 sm:$0xff]  }
   0x2   :  { %111 = vmatprep.subr.bf16.mxu0 %v482_v0  ;;  %v487_v4 = vld [vmem:[%s670_s1 + $0x10] ss:$8 sps:$4 sm:$0xff]   ;;  %v488_v5 = vld [vmem:[%s670_s1 + $0x24] ss:$8 sps:$4 sm:$0xff]   ;;  %v490_v6 = vld [vmem:[%s670_s1 + $0x20] ss:$8 sps:$4 sm:$0xff]  }
   0x3   :  { %112 = vmatpush1.bf16.msra.mxu0 %v484_v2  ;;  %v491_v7 = vld [vmem:[%s670_s1 + $0x34] ss:$8 sps:$4 sm:$0xff]   ;;  %v496_v8 = vld [vmem:[%s672_s3 + $0x40] sm:$0xff]   ;;  %v498_v10 = vld [vmem:[%s672_s3 + $0x48] sm:$0xff]   ;;  %v45_v28 = vshrl.u32 %v44_v27, 7 }
   0x4   :  { %113 = vmatprep.subr.bf16.mxu0 %v485_v3  ;;  %v497_v9 = vld [vmem:[%s672_s3] sm:$0xff]   ;;  %452 = vmatprep.subr.bf16.mxu1 %v496_v8  ;;  %v493_v11 = vld [vmem:[%s670_s1 + $0x30] ss:$8 sps:$4 sm:$0xff]   ;;  %v499_v12 = vld [vmem:[%s672_s3 + $0x8] sm:$0xff]  }
   0x5   :  { %453 = vmatpush3.bf16.msra.mxu1 %v497_v9  ;;  %v494_v13 = vld [vmem:[%s671_s0] sm:$0xff]   ;;  %v495_v14 = vld [vmem:[%s671_s0 + $0x8] sm:$0xff]   ;;  %v500_v15 = vld [vmem:[%s672_s3 + $0x50] sm:$0xff]   ;;  %v46_v29 = vsub.s32 0, %v45_v28  ;;  %v50_v31 = vsub.s32 1, %v45_v28 }
   0x6   :  { %454 = vmatprep.subr.bf16.mxu1 %v498_v10  ;;  %v501_v16 = vld [vmem:[%s672_s3 + $0x10] sm:$0xff]   ;;  %v502_v17 = vld [vmem:[%s672_s3 + $0x58] sm:$0xff]   ;;  %v504_v19 = vld [vmem:[%s672_s3 + $0x60] sm:$0xff]  }
   0x7   :  { %114 = vmatpush1.bf16.msra.mxu0 %v487_v4  ;;  %v503_v18 = vld [vmem:[%s672_s3 + $0x18] sm:$0xff]   ;;  %v505_v20 = vld [vmem:[%s672_s3 + $0x20] sm:$0xff]   ;;  %v506_v21 = vld [vmem:[%s672_s3 + $0x68] sm:$0xff]  }
   0x8   :  { %115 = vmatprep.subr.bf16.mxu0 %v488_v5  ;;  %v507_v22 = vld [vmem:[%s672_s3 + $0x28] sm:$0xff]   ;;  %v508_v23 = vld [vmem:[%s672_s3 + $0x70] sm:$0xff]   ;;  %v510_v25 = vld [vmem:[%s672_s3 + $0x78] sm:$0xff]  }
   0x9   :  { %455 = vmatpush3.bf16.msra.mxu1 %v499_v12  ;;  %v509_v24 = vld [vmem:[%s672_s3 + $0x30] sm:$0xff]   ;;  %v511_v26 = vld [vmem:[%s672_s3 + $0x38] sm:$0xff]   ;;  %v42_v30 = vld [vmem:[%s673_s2] sm:$0x3] }
   0xa   :  { %456 = vmatprep.subr.bf16.mxu1 %v500_v15  ;;  %v47_v32 = vrot.slane %v42_v30, %v46_v29  ;;  %v51_v33 = vrot.slane %v42_v30, %v50_v31  ;;  %v529_v30 = vmov 0.0  }
   0xb   :  { %116 = vmatpush1.bf16.msra.mxu0 %v490_v6  ;;  %26 = vst.msk [vmem:[#allocation2] sm:$0xff] %vm25_vm0, %v529_v30  ;;  %27 = vst.msk [vmem:[#allocation2 + $0x8] sm:$0xff] %vm25_vm0, %v529_v30 }
   0xc   :  { %117 = vmatprep.subr.bf16.mxu0 %v491_v7  ;;  %28 = vst.msk [vmem:[#allocation2 + $0x10] sm:$0xff] %vm25_vm0, %v529_v30  ;;  %29 = vst.msk [vmem:[#allocation2 + $0x18] sm:$0xff] %vm25_vm0, %v529_v30 }
   0xd   :  { %457 = vmatpush3.bf16.msra.mxu1 %v501_v16 }
   0xe   :  { %458 = vmatprep.subr.bf16.mxu1 %v502_v17 }
   0xf   :  { %118 = vmatpush1.bf16.msra.mxu0 %v493_v11 }
  0x11   :  { %459 = vmatpush3.bf16.msra.mxu1 %v503_v18 }
  0x12   :  { %433 = vmatmul.mubr.msk.bf16.vlgmr.msra.gmra.mrb[0].mxu0 %vm25_vm0, %v494_v13  ;;  %460 = vmatprep.subr.bf16.mxu1 %v504_v19 }
  0x13   :  { %153 = vmatprep.mubr.bf16.mxu0 %v528_v1 }
  0x15   :  { %461 = vmatpush3.bf16.msra.mxu1 %v505_v20 }
  0x16   :  { %462 = vmatprep.subr.bf16.mxu1 %v506_v21 }
  0x19   :  { %463 = vmatpush3.bf16.msra.mxu1 %v507_v22 }
  0x1a   :  { %434 = vmatmul.mubr.msk.bf16.gmra.mrb[4].mxu0 %vm25_vm0, %v495_v14  ;;  %464 = vmatprep.subr.bf16.mxu1 %v508_v23 }
  0x1d   :  { %465 = vmatpush3.bf16.msra.mxu1 %v509_v24 }
  0x1e   :  { %466 = vmatprep.subr.bf16.mxu1 %v510_v25 }
  0x21   :  { %467 = vmatpush3.bf16.msra.mxu1 %v511_v26 }
  0xe5   :  { %v145_v34 = vpop.f32.mrb[0].mxu0 }
  0xe6   :  { %v146_v35 = vadd.f32 %v145_v34, %v47_v32  ;;  %v147_v36 = vpop.f32.mrb[1].mxu0 }
  0xe7   :  { %v148_v37 = vadd.f32 %v147_v36, %v51_v33  ;;  %v149_v38 = vpop.f32.mrb[2].mxu0  ;;  %v205_v36 = vld [vmem:[#allocation2 + $0x8] sm:$0xff] }
  0xe8   :  { %v172_v39 = vmul.f32 0.70710677, %v146_v35  ;;  %v150_v40 = vadd.f32 %v149_v38, %v47_v32  ;;  %v151_v41 = vpop.f32.mrb[3].mxu0  ;;  %v164_v0 = vmul.f32 0.5, %v146_v35 }
  0xe9   :  { %v173_v42 = vmul.f32 0.70710677, %v148_v37  ;;  %v152_v43 = vadd.f32 %v151_v41, %v51_v33  ;;  %v165_v3 = vmul.f32 0.5, %v148_v37 }
  0xea   :  { %512 = verf.f32 %v172_v39  ;;  %v174_v44 = vmul.f32 0.70710677, %v150_v40  ;;  %v166_v1 = vmul.f32 0.5, %v150_v40 }
  0xeb   :  { %514 = verf.f32 %v173_v42  ;;  %v175_v45 = vmul.f32 0.70710677, %v152_v43  ;;  %v167_v4 = vmul.f32 0.5, %v152_v43  ;;  %v206_v42 = vld [vmem:[#allocation2 + $0x10] sm:$0xff] }
  0xec   :  { %516 = verf.f32 %v174_v44 }
  0xed   :  { %518 = verf.f32 %v175_v45  ;;  %v155_v46 = vpop.f32.mrb[4].mxu0 }
  0xee   :  { %v156_v47 = vadd.f32 %v155_v46, %v47_v32  ;;  %v157_v48 = vpop.f32.mrb[5].mxu0  ;;  %v451_v46 = vld [vmem:[%s674_s4] ss:$0 sm:$0xff] }
  0xef   :  { %v158_v49 = vadd.f32 %v157_v48, %v51_v33  ;;  %v159_v50 = vpop.f32.mrb[6].mxu0 }
  0xf0   :  { %v176_v51 = vmul.f32 0.70710677, %v156_v47  ;;  %v160_v52 = vadd.f32 %v159_v50, %v47_v32  ;;  %v161_v53 = vpop.f32.mrb[7].mxu0  ;;  %v168_v18 = vmul.f32 0.5, %v156_v47  ;;  %v204_v32 = vld [vmem:[#allocation2] sm:$0xff]  ;;  %v207_v47 = vld [vmem:[#allocation2 + $0x18] sm:$0xff] }
  0xf1   :  { %v177_v54 = vmul.f32 0.70710677, %v158_v49  ;;  %v162_v55 = vadd.f32 %v161_v53, %v51_v33  ;;  %v169_v21 = vmul.f32 0.5, %v158_v49 }
  0xf2   :  { %520 = verf.f32 %v176_v51  ;;  %v178_v56 = vmul.f32 0.70710677, %v160_v52  ;;  %v170_v19 = vmul.f32 0.5, %v160_v52 }
  0xf3   :  { %522 = verf.f32 %v177_v54  ;;  %v179_v57 = vmul.f32 0.70710677, %v162_v55  ;;  %v171_v22 = vmul.f32 0.5, %v162_v55 }
  0xf4   :  { %v513_v58 = vpop.eup %512  ;;  %524 = verf.f32 %v178_v56 }
  0xf5   :  { %v515_v59 = vpop.eup %514  ;;  %v188_v60 = vadd.f32 1.0, %v513_v58  ;;  %526 = verf.f32 %v179_v57 }
  0xf6   :  { %v517_v61 = vpop.eup %516  ;;  %v189_v62 = vadd.f32 1.0, %v515_v59 }
  0xf7   :  { %v519_v63 = vpop.eup %518  ;;  %v190_v2 = vadd.f32 1.0, %v517_v61  ;;  %v196_v6 = vmul.f32 %v188_v60, %v164_v0 }
  0xf8   :  { %v191_v5 = vadd.f32 1.0, %v519_v63  ;;  %v197_v8 = vmul.f32 %v189_v62, %v165_v3 }
  0xf9   :  { %v198_v7 = vmul.f32 %v190_v2, %v166_v1 }
  0xfa   :  { %v199_v9 = vmul.f32 %v191_v5, %v167_v4 }
  0xfb   :  { %v208_v10 = vpack.c.bf16 %v198_v7, %v196_v6 }
  0xfc   :  { %v521_v11 = vpop.eup %520  ;;  %v209_v12 = vpack.c.bf16 %v199_v9, %v197_v8 }
  0xfd   :  { %v523_v13 = vpop.eup %522  ;;  %v192_v14 = vadd.f32 1.0, %v521_v11 }
  0xfe   :  { %v525_v15 = vpop.eup %524  ;;  %v193_v16 = vadd.f32 1.0, %v523_v13  ;;  %372 = vmatprep.mubr.bf16.mxu1 %v209_v12 }
  0xff   :  { %v527_v17 = vpop.eup %526  ;;  %v194_v20 = vadd.f32 1.0, %v525_v15  ;;  %373 = vmatmul.mubr.bf16.vlgmr.msra.gmra.mrb[0].mxu1 %v208_v10  ;;  %v200_v24 = vmul.f32 %v192_v14, %v168_v18 }
 0x100   :  { %v195_v23 = vadd.f32 1.0, %v527_v17  ;;  %v201_v26 = vmul.f32 %v193_v16, %v169_v21 }
 0x101   :  { %v202_v25 = vmul.f32 %v194_v20, %v170_v19 }
 0x102   :  { %v203_v27 = vmul.f32 %v195_v23, %v171_v22 }
 0x103   :  { %v210_v28 = vpack.c.bf16 %v202_v25, %v200_v24 }
 0x104   :  { %v211_v29 = vpack.c.bf16 %v203_v27, %v201_v26 }
 0x106   :  { %380 = vmatprep.mubr.bf16.mxu1 %v211_v29 }
 0x107   :  { %381 = vmatmul.mubr.bf16.gmra.mrb[4].mxu1 %v210_v28 }
 0x1d2   :  { %v468_v31 = vpop.f32.mrb[0].mxu1 }
 0x1d3   :  { %v469_v33 = vpop.f32.mrb[1].mxu1 }
 0x1d4   :  { %v470_v34 = vadd.f32 %v469_v33, %v468_v31  ;;  %v471_v35 = vpop.f32.mrb[2].mxu1 }
 0x1d5   :  { %v472_v37 = vpop.f32.mrb[3].mxu1 }
 0x1d6   :  { %v389_v38 = vadd.f32 %v470_v34, %v204_v32  ;;  %v473_v39 = vadd.f32 %v472_v37, %v471_v35 }
 0x1d8   :  { %393 = vst.msk [vmem:[#allocation2] sm:$0xff] %vm25_vm0, %v389_v38  ;;  %v390_v40 = vadd.f32 %v473_v39, %v205_v36 }
 0x1da   :  { %394 = vst.msk [vmem:[#allocation2 + $0x8] sm:$0xff] %vm25_vm0, %v390_v40  ;;  %v474_v41 = vpop.f32.mrb[4].mxu1 }
 0x1db   :  { %v475_v43 = vpop.f32.mrb[5].mxu1 }
 0x1dc   :  { %v476_v44 = vadd.f32 %v475_v43, %v474_v41  ;;  %v477_v45 = vpop.f32.mrb[6].mxu1 }
 0x1dd   :  { %v478_v48 = vpop.f32.mrb[7].mxu1 }
 0x1de   :  { %v391_v49 = vadd.f32 %v476_v44, %v206_v42  ;;  %v479_v50 = vadd.f32 %v478_v48, %v477_v45 }
 0x1df   :  { %v400_v51 = vld [vmem:[#allocation2] sm:$0xff] }
 0x1e0   :  { %v411_v52 = vadd.f32 %v451_v46, %v400_v51  ;;  %395 = vst.msk [vmem:[#allocation2 + $0x10] sm:$0xff] %vm25_vm0, %v391_v49  ;;  %v392_v53 = vadd.f32 %v479_v50, %v207_v47 }
 0x1e1   :  { %v401_v54 = vld [vmem:[#allocation2 + $0x8] sm:$0xff] }
 0x1e2   :  { %415 = vst.msk [vmem:[%s675_s5] sm:$0xff] %vm25_vm0, %v411_v52  ;;  %v412_v55 = vadd.f32 %v451_v46, %v401_v54  ;;  %396 = vst.msk [vmem:[#allocation2 + $0x18] sm:$0xff] %vm25_vm0, %v392_v53 }
 0x1e4   :  { %416 = vst.msk [vmem:[%s675_s5 + $0x8] sm:$0xff] %vm25_vm0, %v412_v55 }
 0x1e7   :  { %v402_v56 = vld [vmem:[#allocation2 + $0x10] sm:$0xff] }
 0x1e8   :  { %v413_v57 = vadd.f32 %v451_v46, %v402_v56 }
 0x1e9   :  { %v403_v58 = vld [vmem:[#allocation2 + $0x18] sm:$0xff] }
 0x1ea   :  { %417 = vst.msk [vmem:[%s675_s5 + $0x10] sm:$0xff] %vm25_vm0, %v413_v57  ;;  %v414_v59 = vadd.f32 %v451_v46, %v403_v58 }
 0x1ec   :  { %418 = vst.msk [vmem:[%s675_s5 + $0x18] sm:$0xff] %vm25_vm0, %v414_v59 }

</bundles_post_ra>
